<compile_context>
chip_gen: v7x
topology: tpu7x:2x2x1
jax: 0.10.0
libtpu: 0.0.40
codegen_flags: <defaults>
</compile_context>

<pallas_src>
import math
import functools

import jax
import jax.numpy as jnp
from jax.experimental import pallas as pl
from jax.experimental.pallas import tpu as pltpu


def _rup(x, m):
    return ((x + m - 1) // m) * m


_PREFS_M = (512, 256, 128, 64, 32, 16, 8)
_PREFS_KN = (512, 256, 128)


def _dim_plan(d, align, prefs, pad_small=False):
    """Pick (tile, padded_dim) honoring the TPU (8,128) block rule with
    minimal padding.  tile always divides padded_dim."""
    if d < align:
        if pad_small:
            return align, align
        return d, d                      # block == full array dim is legal
    p = _rup(d, align)
    for t in prefs:
        if t <= p and p % t == 0:
            return t, p
    return align, p


# ---------------------------------------------------------------------------
# Kernel 1: tiled matmul (bf16 x bf16 -> f32 accumulated in the resident
# output block) + per-column sum / sum-of-squares accumulated in the epilogue
# (single-pass statistics for training-mode BatchNorm).
# Grid order is (n, m, k): the stats block (0, n) stays resident across the
# whole m and k loops, so it is never revisited.
# ---------------------------------------------------------------------------
def _mm_stats_kernel(a_ref, b_ref, o_ref, sum_ref, sq_ref):
    i = pl.program_id(1)          # m tile
    k = pl.program_id(2)          # k tile (innermost)

    @pl.when(k == 0)
    def _():
        o_ref[...] = jnp.zeros_like(o_ref)

    @pl.when(jnp.logical_and(i == 0, k == 0))
    def _():
        sum_ref[...] = jnp.zeros_like(sum_ref)
        sq_ref[...] = jnp.zeros_like(sq_ref)

    o_ref[...] += jnp.dot(a_ref[...], b_ref[...],
                          preferred_element_type=jnp.float32)

    @pl.when(k == pl.num_programs(2) - 1)
    def _():
        y = o_ref[...]
        sum_ref[...] += jnp.sum(y, axis=0, keepdims=True)
        sq_ref[...] += jnp.sum(y * y, axis=0, keepdims=True)


@jax.jit
def _matmul_stats(a, b):
    """(M,K)@(K,N).  bf16 MXU inputs, f32 accumulation.
    Returns (out_f32, per-column sum, per-column sum-of-squares)."""
    M, K = a.shape
    _, N = b.shape
    bm, Mp = _dim_plan(M, 8, _PREFS_M)
    bk, Kp = _dim_plan(K, 128, _PREFS_KN)
    bn, Np = _dim_plan(N, 128, _PREFS_KN, pad_small=True)
    a = a.astype(jnp.bfloat16)
    b = b.astype(jnp.bfloat16)
    if (Mp, Kp) != (M, K):
        a = jnp.pad(a, ((0, Mp - M), (0, Kp - K)))
    if (Kp, Np) != (K, N):
        b = jnp.pad(b, ((0, Kp - K), (0, Np - N)))
    out, csum, csq = pl.pallas_call(
        _mm_stats_kernel,
        out_shape=(jax.ShapeDtypeStruct((Mp, Np), jnp.float32),
                   jax.ShapeDtypeStruct((1, Np), jnp.float32),
                   jax.ShapeDtypeStruct((1, Np), jnp.float32)),
        grid_spec=pltpu.PrefetchScalarGridSpec(
            num_scalar_prefetch=0,
            grid=(Np // bn, Mp // bm, Kp // bk),
            in_specs=[pl.BlockSpec((bm, bk), lambda j, i, k: (i, k)),
                      pl.BlockSpec((bk, bn), lambda j, i, k: (k, j))],
            out_specs=[pl.BlockSpec((bm, bn), lambda j, i, k: (i, j)),
                       pl.BlockSpec((1, bn), lambda j, i, k: (0, j)),
                       pl.BlockSpec((1, bn), lambda j, i, k: (0, j))]),
        compiler_params=pltpu.CompilerParams(
            dimension_semantics=("parallel", "arbitrary", "arbitrary")),
    )(a, b)
    if (Mp, Np) != (M, N):
        out = out[:M, :N]
        csum = csum[:, :N]
        csq = csq[:, :N]
    return out, csum[0], csq[0]


# ---------------------------------------------------------------------------
# Kernel 2: fused per-channel affine (BatchNorm) + ReLU.
# Kernel 3: fused bn3 + shortcut-BN + residual add + ReLU.
# ---------------------------------------------------------------------------
def _chan_plan(C):
    return C if (C < 128 or C % 128 == 0) else _rup(C, 128)


def _row_plan(M, Cp, budget=1 << 20):
    cap = max(8, (budget // (Cp * 4)) // 8 * 8)
    tr = min(_rup(M, 8), 2048, cap)
    return tr, _rup(M, tr)


def _bn_relu_kernel(y_ref, s_ref, b_ref, o_ref):
    o_ref[...] = jnp.maximum(y_ref[...] * s_ref[...] + b_ref[...],
                             0.0).astype(o_ref.dtype)


@functools.partial(jax.jit, static_argnames=("out_dtype",))
def _bn_relu(y, scale, shift, *, out_dtype):
    """relu(y * scale + shift) with per-column scale/shift on an (M, C) slab."""
    M, C = y.shape
    Cp = _chan_plan(C)
    tr, Mp = _row_plan(M, Cp)
    if (Mp, Cp) != (M, C):
        y = jnp.pad(y, ((0, Mp - M), (0, Cp - C)))
        scale = jnp.pad(scale, (0, Cp - C))
        shift = jnp.pad(shift, (0, Cp - C))
    out = pl.pallas_call(
        _bn_relu_kernel,
        out_shape=jax.ShapeDtypeStruct((Mp, Cp), out_dtype),
        grid=(Mp // tr,),
        in_specs=[pl.BlockSpec((tr, Cp), lambda i: (i, 0)),
                  pl.BlockSpec((1, Cp), lambda i: (0, 0)),
                  pl.BlockSpec((1, Cp), lambda i: (0, 0))],
        out_specs=pl.BlockSpec((tr, Cp), lambda i: (i, 0)),
        compiler_params=pltpu.CompilerParams(
            dimension_semantics=("parallel",)),
    )(y, scale.reshape(1, Cp).astype(jnp.float32),
      shift.reshape(1, Cp).astype(jnp.float32))
    if (Mp, Cp) != (M, C):
        out = out[:M, :C]
    return out


def _bn_add_relu_kernel(y_ref, r_ref, s1_ref, b1_ref, s2_ref, b2_ref, o_ref):
    y = y_ref[...] * s1_ref[...] + b1_ref[...]
    r = r_ref[...].astype(jnp.float32) * s2_ref[...] + b2_ref[...]
    o_ref[...] = jnp.maximum(y + r, 0.0).astype(o_ref.dtype)


@jax.jit
def _bn_add_relu(y, y_scale, y_shift, r, r_scale, r_shift):
    """relu((y*ys+yb) + (r*rs+rb)): bn3, shortcut-BN, add and ReLU in one pass."""
    M, C = y.shape
    Cp = _chan_plan(C)
    tr, Mp = _row_plan(M, Cp)
    if (Mp, Cp) != (M, C):
        y = jnp.pad(y, ((0, Mp - M), (0, Cp - C)))
        r = jnp.pad(r, ((0, Mp - M), (0, Cp - C)))
        y_scale = jnp.pad(y_scale, (0, Cp - C))
        y_shift = jnp.pad(y_shift, (0, Cp - C))
        r_scale = jnp.pad(r_scale, (0, Cp - C))
        r_shift = jnp.pad(r_shift, (0, Cp - C))
    out = pl.pallas_call(
        _bn_add_relu_kernel,
        out_shape=jax.ShapeDtypeStruct((Mp, Cp), jnp.float32),
        grid=(Mp // tr,),
        in_specs=[pl.BlockSpec((tr, Cp), lambda i: (i, 0)),
                  pl.BlockSpec((tr, Cp), lambda i: (i, 0)),
                  pl.BlockSpec((1, Cp), lambda i: (0, 0)),
                  pl.BlockSpec((1, Cp), lambda i: (0, 0)),
                  pl.BlockSpec((1, Cp), lambda i: (0, 0)),
                  pl.BlockSpec((1, Cp), lambda i: (0, 0))],
        out_specs=pl.BlockSpec((tr, Cp), lambda i: (i, 0)),
        compiler_params=pltpu.CompilerParams(
            dimension_semantics=("parallel",)),
    )(y, r,
      y_scale.reshape(1, Cp).astype(jnp.float32),
      y_shift.reshape(1, Cp).astype(jnp.float32),
      r_scale.reshape(1, Cp).astype(jnp.float32),
      r_shift.reshape(1, Cp).astype(jnp.float32))
    if (Mp, Cp) != (M, C):
        out = out[:M, :C]
    return out


# ---------------------------------------------------------------------------
# Convolution = im2col (NHWC, only for 3x3) + Pallas matmul-with-stats.
# ---------------------------------------------------------------------------
def _conv_nhwc(x_nhwc, w, stride=1, padding=0, dilation=1):
    """x: (N,H,W,Cin) (bf16), w: (Cout,Cin,KH,KW) torch layout.
    Returns flat pre-BN output (N*OH*OW, Cout) f32, per-channel sum and
    sum-of-squares (one-pass BN stats) and the output spatial shape."""
    N, H, W, Cin = x_nhwc.shape
    Cout, _, KH, KW = w.shape
    OH = (H + 2 * padding - dilation * (KH - 1) - 1) // stride + 1
    OW = (W + 2 * padding - dilation * (KW - 1) - 1) // stride + 1
    if KH == 1 and KW == 1 and padding == 0:
        xs = x_nhwc if stride == 1 else x_nhwc[:, ::stride, ::stride, :]
        A = xs.reshape(N * OH * OW, Cin)
    else:
        # TODO(synk): the 3x3 im2col slab is still staged by XLA; folding the
        # (kh,kw) taps into the matmul K grid with element-offset index_maps
        # would remove this HBM copy entirely.
        xp = jnp.pad(x_nhwc, ((0, 0), (padding, padding),
                              (padding, padding), (0, 0)))
        cols = []
        for kh in range(KH):
            for kw in range(KW):
                h0, w0 = kh * dilation, kw * dilation
                cols.append(xp[:, h0:h0 + (OH - 1) * stride + 1:stride,
                               w0:w0 + (OW - 1) * stride + 1:stride, :])
        A = jnp.concatenate(cols, axis=-1).reshape(N * OH * OW, KH * KW * Cin)
    Wm = jnp.transpose(w, (2, 3, 1, 0)).reshape(KH * KW * Cin, Cout)
    y, csum, csq = _matmul_stats(A, Wm)
    return y, csum, csq, (N, OH, OW)


def _bn_scale_shift(csum, csq, rows, gamma, beta, eps=1e-5):
    """Training-mode BatchNorm affine from single-pass column statistics."""
    mean = csum / rows
    var = jnp.maximum(csq / rows - mean * mean, 0.0)
    scale = gamma * jax.lax.rsqrt(var + eps)
    return scale, beta - mean * scale


# ---------------------------------------------------------------------------
# Bottleneck forward (matches the torch module's forward semantics).
# ---------------------------------------------------------------------------
def bottleneck_forward(x_nchw, p):
    stride, dilation = p["stride"], p["dilation"]
    N, Cin, H, W = x_nchw.shape
    x_nhwc = jnp.transpose(x_nchw, (0, 2, 3, 1))       # NCHW -> NHWC (once)
    x_bf = x_nhwc.astype(jnp.bfloat16)

    # conv1 (1x1) -> bn1 -> relu
    y1, s1, q1, (n, h1, w1) = _conv_nhwc(x_bf, p["conv1_w"])
    sc, sh = _bn_scale_shift(s1, q1, n * h1 * w1, p["bn1_g"], p["bn1_b"])
    a1 = _bn_relu(y1, sc, sh, out_dtype=jnp.bfloat16).reshape(n, h1, w1, -1)

    # conv2 (3x3, stride, dilation) -> bn2 -> relu
    pad = (3 * dilation - 1) // 2
    y2, s2, q2, (n, h2, w2) = _conv_nhwc(a1, p["conv2_w"], stride=stride,
                                         padding=pad, dilation=dilation)
    m2 = n * h2 * w2
    sc, sh = _bn_scale_shift(s2, q2, m2, p["bn2_g"], p["bn2_b"])
    a2 = _bn_relu(y2, sc, sh, out_dtype=jnp.bfloat16).reshape(n, h2, w2, -1)

    # conv3 (1x1); its bn3 affine is folded into the final fused kernel
    y3, s3, q3, _ = _conv_nhwc(a2, p["conv3_w"])
    sc3, sh3 = _bn_scale_shift(s3, q3, m2, p["bn3_g"], p["bn3_b"])
    cout = y3.shape[1]

    # shortcut: projection (1x1 conv, stride + BN) or identity
    if p["down_conv_w"] is not None:
        yd, sd, qd, _ = _conv_nhwc(x_bf, p["down_conv_w"], stride=stride)
        scd, shd = _bn_scale_shift(sd, qd, m2, p["down_bn_g"], p["down_bn_b"])
        r = yd
    else:
        r = x_nhwc.reshape(N * H * W, Cin)
        scd = jnp.ones((cout,), jnp.float32)
        shd = jnp.zeros((cout,), jnp.float32)

    out = _bn_add_relu(y3, sc3, sh3, r, scd, shd)      # fused bn3+bn_ds+add+relu
    return jnp.transpose(out.reshape(n, h2, w2, cout), (0, 3, 1, 2))


# ---------------------------------------------------------------------------
# Parameters (deterministic Kaiming-style init; BN gamma=1, beta=0).
# ---------------------------------------------------------------------------
def make_bottleneck_params(key, inplanes, planes, stride=1, downsample=False,
                           dilation=1):
    ks = jax.random.split(key, 4)

    def conv_w(k, cin, cout, ksz):
        std = math.sqrt(2.0 / (cin * ksz * ksz))
        return (std * jax.random.normal(k, (cout, cin, ksz, ksz))
                ).astype(jnp.float32)

    p = {"stride": stride, "dilation": dilation,
         "conv1_w": conv_w(ks[0], inplanes, planes, 1),
         "bn1_g": jnp.ones((planes,), jnp.float32),
         "bn1_b": jnp.zeros((planes,), jnp.float32),
         "conv2_w": conv_w(ks[1], planes, planes, 3),
         "bn2_g": jnp.ones((planes,), jnp.float32),
         "bn2_b": jnp.zeros((planes,), jnp.float32),
         "conv3_w": conv_w(ks[2], planes, planes * 4, 1),
         "bn3_g": jnp.ones((planes * 4,), jnp.float32),
         "bn3_b": jnp.zeros((planes * 4,), jnp.float32),
         "down_conv_w": None, "down_bn_g": None, "down_bn_b": None}
    if downsample:
        p["down_conv_w"] = conv_w(ks[3], inplanes, planes * 4, 1)
        p["down_bn_g"] = jnp.ones((planes * 4,), jnp.float32)
        p["down_bn_b"] = jnp.zeros((planes * 4,), jnp.float32)
    return p


# ---------------------------------------------------------------------------
if __name__ == "__main__":
    root = jax.random.PRNGKey(0)
    kx, kA, kB = jax.random.split(root, 3)

    x = jax.random.normal(kx, (2, 64, 16, 16), dtype=jnp.float32)

    # Identity-shortcut block: inplanes == planes*4, stride 1.
    pA = make_bottleneck_params(kA, inplanes=64, planes=16, stride=1,
                                downsample=False)
    outA = jax.jit(lambda v: bottleneck_forward(v, pA))(x)

    # Projection-shortcut block: stride 2, 1x1 downsample conv + BN.
    pB = make_bottleneck_params(kB, inplanes=64, planes=32, stride=2,
                                downsample=True)
    outB = jax.jit(lambda v: bottleneck_forward(v, pB))(x)

    outA, outB = jax.block_until_ready((outA, outB))
    assert outA.shape == (2, 64, 16, 16), outA.shape
    assert outB.shape == (2, 128, 8, 8), outB.shape
    assert bool(jnp.all(jnp.isfinite(outA)))
    assert bool(jnp.all(jnp.isfinite(outB)))
    assert bool(jnp.all(outA >= 0)) and bool(jnp.all(outB >= 0))
    print("KERNEL_OK")
</pallas_src>

<mosaic_0001>
module attributes {stable_mosaic.version = 11 : i64} {
  func.func @_mm_stats_kernel(%arg0: i32, %arg1: i32, %arg2: i32, %arg3: memref<512x64xbf16, #tpu.memory_space<vmem>>, %arg4: memref<64x128xbf16, #tpu.memory_space<vmem>>, %arg5: memref<512x128xf32, #tpu.memory_space<vmem>>, %arg6: memref<1x128xf32, #tpu.memory_space<vmem>>, %arg7: memref<1x128xf32, #tpu.memory_space<vmem>>) attributes {dimension_semantics = [#tpu.dimension_semantics<parallel>, #tpu.dimension_semantics<arbitrary>, #tpu.dimension_semantics<arbitrary>], iteration_bounds = array<i64: 1, 1, 1>, scalar_prefetch = 0 : i64, scratch_operands = 0 : i64, tpu.core_type = #tpu.core_type<tc>, window_params = [{transform_indices = @transform_0, window_bounds = array<i64: 512, 64>}, {transform_indices = @transform_1, window_bounds = array<i64: 64, 128>}, {transform_indices = @transform_2, window_bounds = array<i64: 512, 128>}, {transform_indices = @transform_3, window_bounds = array<i64: 1, 128>}, {transform_indices = @transform_4, window_bounds = array<i64: 1, 128>}]} {
    %c0_i32 = arith.constant 0 : i32
    %0 = arith.cmpi eq, %arg2, %c0_i32 : i32
    %1 = arith.extui %0 : i1 to i32
    %c0_i32_0 = arith.constant 0 : i32
    %2 = arith.cmpi ne, %1, %c0_i32_0 : i32
    scf.if %2 {
      %cst_13 = arith.constant 0.000000e+00 : f32
      %17 = vector.broadcast %cst_13 : f32 to vector<512x128xf32>
      %c0_14 = arith.constant 0 : index
      %c0_15 = arith.constant 0 : index
      %18 = vector.load %arg5[%c0_14, %c0_15] : memref<512x128xf32, #tpu.memory_space<vmem>>, vector<512x128xf32>
      tpu.vector_store %arg5[%c0_14, %c0_15], %17 {strides = array<i32>} : memref<512x128xf32, #tpu.memory_space<vmem>>, vector<512x128xf32>,
    } else {
    }
    %c0_i32_1 = arith.constant 0 : i32
    %3 = arith.cmpi eq, %arg1, %c0_i32_1 : i32
    %c0_i32_2 = arith.constant 0 : i32
    %4 = arith.cmpi eq, %arg2, %c0_i32_2 : i32
    %5 = arith.andi %3, %4 : i1
    %6 = arith.extui %5 : i1 to i32
    %c0_i32_3 = arith.constant 0 : i32
    %7 = arith.cmpi ne, %6, %c0_i32_3 : i32
    scf.if %7 {
      %cst_13 = arith.constant 0.000000e+00 : f32
      %17 = vector.broadcast %cst_13 : f32 to vector<1x128xf32>
      %c0_14 = arith.constant 0 : index
      %c0_15 = arith.constant 0 : index
      %18 = vector.load %arg6[%c0_14, %c0_15] : memref<1x128xf32, #tpu.memory_space<vmem>>, vector<1x128xf32>
      tpu.vector_store %arg6[%c0_14, %c0_15], %17 {strides = array<i32>} : memref<1x128xf32, #tpu.memory_space<vmem>>, vector<1x128xf32>,
      %cst_16 = arith.constant 0.000000e+00 : f32
      %19 = vector.broadcast %cst_16 : f32 to vector<1x128xf32>
      %c0_17 = arith.constant 0 : index
      %c0_18 = arith.constant 0 : index
      %20 = vector.load %arg7[%c0_17, %c0_18] : memref<1x128xf32, #tpu.memory_space<vmem>>, vector<1x128xf32>
      tpu.vector_store %arg7[%c0_17, %c0_18], %19 {strides = array<i32>} : memref<1x128xf32, #tpu.memory_space<vmem>>, vector<1x128xf32>,
    } else {
    }
    %c0 = arith.constant 0 : index
    %c0_4 = arith.constant 0 : index
    %8 = vector.load %arg5[%c0, %c0_4] : memref<512x128xf32, #tpu.memory_space<vmem>>, vector<512x128xf32>
    %c0_5 = arith.constant 0 : index
    %c0_6 = arith.constant 0 : index
    %9 = vector.load %arg3[%c0_5, %c0_6] : memref<512x64xbf16, #tpu.memory_space<vmem>>, vector<512x64xbf16>
    %c0_7 = arith.constant 0 : index
    %c0_8 = arith.constant 0 : index
    %10 = vector.load %arg4[%c0_7, %c0_8] : memref<64x128xbf16, #tpu.memory_space<vmem>>, vector<64x128xbf16>
    %cst = arith.constant dense<0.000000e+00> : vector<512x128xf32>
    %11 = tpu.matmul %9, %10, %cst {dimension_numbers = #tpu.dot_dimension_numbers<[1], [0], [0], [1], [0, 0, 1, 1], [], []>} : vector<512x64xbf16>, vector<64x128xbf16>, vector<512x128xf32> -> vector<512x128xf32>
    %12 = arith.addf %8, %11 : vector<512x128xf32>
    %c0_9 = arith.constant 0 : index
    %c0_10 = arith.constant 0 : index
    %13 = vector.load %arg5[%c0_9, %c0_10] : memref<512x128xf32, #tpu.memory_space<vmem>>, vector<512x128xf32>
    tpu.vector_store %arg5[%c0_9, %c0_10], %12 {strides = array<i32>} : memref<512x128xf32, #tpu.memory_space<vmem>>, vector<512x128xf32>,
    %c0_i32_11 = arith.constant 0 : i32
    %14 = arith.cmpi eq, %arg2, %c0_i32_11 : i32
    %15 = arith.extui %14 : i1 to i32
    %c0_i32_12 = arith.constant 0 : i32
    %16 = arith.cmpi ne, %15, %c0_i32_12 : i32
    scf.if %16 {
      %c0_13 = arith.constant 0 : index
      %c0_14 = arith.constant 0 : index
      %17 = vector.load %arg5[%c0_13, %c0_14] : memref<512x128xf32, #tpu.memory_space<vmem>>, vector<512x128xf32>
      %c0_15 = arith.constant 0 : index
      %c0_16 = arith.constant 0 : index
      %18 = vector.load %arg6[%c0_15, %c0_16] : memref<1x128xf32, #tpu.memory_space<vmem>>, vector<1x128xf32>
      %cst_17 = arith.constant dense<0.000000e+00> : vector<128xf32>
      %19 = vector.multi_reduction <add>, %17, %cst_17 [0] : vector<512x128xf32> to vector<128xf32>
      %20 = vector.shape_cast %19 : vector<128xf32> to vector<1x128xf32>
      %21 = arith.addf %18, %20 : vector<1x128xf32>
      %c0_18 = arith.constant 0 : index
      %c0_19 = arith.constant 0 : index
      %22 = vector.load %arg6[%c0_18, %c0_19] : memref<1x128xf32, #tpu.memory_space<vmem>>, vector<1x128xf32>
      tpu.vector_store %arg6[%c0_18, %c0_19], %21 {strides = array<i32>} : memref<1x128xf32, #tpu.memory_space<vmem>>, vector<1x128xf32>,
      %c0_20 = arith.constant 0 : index
      %c0_21 = arith.constant 0 : index
      %23 = vector.load %arg7[%c0_20, %c0_21] : memref<1x128xf32, #tpu.memory_space<vmem>>, vector<1x128xf32>
      %24 = arith.mulf %17, %17 : vector<512x128xf32>
      %cst_22 = arith.constant dense<0.000000e+00> : vector<128xf32>
      %25 = vector.multi_reduction <add>, %24, %cst_22 [0] : vector<512x128xf32> to vector<128xf32>
      %26 = vector.shape_cast %25 : vector<128xf32> to vector<1x128xf32>
      %27 = arith.addf %23, %26 : vector<1x128xf32>
      %c0_23 = arith.constant 0 : index
      %c0_24 = arith.constant 0 : index
      %28 = vector.load %arg7[%c0_23, %c0_24] : memref<1x128xf32, #tpu.memory_space<vmem>>, vector<1x128xf32>
      tpu.vector_store %arg7[%c0_23, %c0_24], %27 {strides = array<i32>} : memref<1x128xf32, #tpu.memory_space<vmem>>, vector<1x128xf32>,
    } else {
    }
    return
  }
  func.func @transform_0(%arg0: i32, %arg1: i32, %arg2: i32) -> (i32, i32) {
    %c0_i32 = arith.constant 0 : i32
    return %arg1, %arg2 : i32, i32
  }
  func.func @transform_1(%arg0: i32, %arg1: i32, %arg2: i32) -> (i32, i32) {
    %c0_i32 = arith.constant 0 : i32
    return %arg2, %arg0 : i32, i32
  }
  func.func @transform_2(%arg0: i32, %arg1: i32, %arg2: i32) -> (i32, i32) {
    %c0_i32 = arith.constant 0 : i32
    return %arg1, %arg0 : i32, i32
  }
  func.func @transform_3(%arg0: i32, %arg1: i32, %arg2: i32) -> (i32, i32) {
    %c0_i32 = arith.constant 0 : i32
    %c0_i32_0 = arith.constant 0 : i32
    return %c0_i32, %arg0 : i32, i32
  }
  func.func @transform_4(%arg0: i32, %arg1: i32, %arg2: i32) -> (i32, i32) {
    %c0_i32 = arith.constant 0 : i32
    %c0_i32_0 = arith.constant 0 : i32
    return %c0_i32, %arg0 : i32, i32
  }
}

</mosaic_0001>

<bundles_post_ra>
// kernel: _matmul_stats.1
= control target key start
LH: loop header
LB: loop body
LE: loop exit
PB: predicated region body
PF: predicated region fallthrough
CT: control target
= control target key end

     0   :  { %vm410_vm0 = vcmask 523264   ;;  %v1432_v36 = vmov 0.0   ;;  %s2000_s1 = inlined_call_operand.vmem [shape: bf16[64,128], index: 1, kind: input, shape index: {}]   ;;  %s2001_s0 = inlined_call_operand.vmem [shape: bf16[512,64], index: 0, kind: input, shape index: {}]   ;;  %s2002_s3 = inlined_call_operand.vmem [shape: f32[1,128], index: 3, kind: output, shape index: {1}]   ;;  %s2003_s4 = inlined_call_operand.vmem [shape: f32[1,128], index: 4, kind: output, shape index: {2}]   ;;  %s2004_s2 = inlined_call_operand.vmem [shape: f32[512,128], index: 2, kind: output, shape index: {0}]  }
   0x1   :  { %v1396_v0 = vld [vmem:[%s2000_s1] sm:$0xff]   ;;  %v1397_v1 = vld [vmem:[%s2000_s1 + $0x8] sm:$0xff]   ;;  %v1398_v2 = vld [vmem:[%s2000_s1 + $0x10] sm:$0xff]   ;;  %88 = vst [vmem:[%s2002_s3] sm:$0x1] %v1432_v36 }
   0x2   :  { %1315 = vmatprep.subr.bf16.mxu0 %v1396_v0  ;;  %1387 = vmatprep.subr.bf16.mxu1 %v1396_v0  ;;  %v1400_v3 = vld [vmem:[%s2001_s0] sm:$0xff]   ;;  %v1399_v4 = vld [vmem:[%s2000_s1 + $0x18] sm:$0xff]   ;;  %v1401_v5 = vld [vmem:[%s2001_s0 + $0x8] sm:$0xff]   ;;  %89 = vst [vmem:[%s2003_s4] sm:$0x1] %v1432_v36 }
   0x3   :  { %1316 = vmatpush3.bf16.msra.mxu0 %v1396_v0  ;;  %1391 = vmatpush3.bf16.msra.mxu1 %v1396_v0  ;;  %v1402_v6 = vld [vmem:[%s2001_s0 + $0x10] sm:$0xff]   ;;  %v1403_v7 = vld [vmem:[%s2001_s0 + $0x18] sm:$0xff]   ;;  %v1416_v8 = vld [vmem:[%s2001_s0 + $0x80] sm:$0xff]  }
   0x4   :  { %1317 = vmatprep.subr.bf16.mxu0 %v1397_v1  ;;  %1388 = vmatprep.subr.bf16.mxu1 %v1397_v1  ;;  %v1417_v9 = vld [vmem:[%s2001_s0 + $0x88] sm:$0xff]   ;;  %v1418_v10 = vld [vmem:[%s2001_s0 + $0x90] sm:$0xff]   ;;  %v1404_v11 = vld [vmem:[%s2001_s0 + $0x20] sm:$0xff]  }
   0x5   :  { %1323 = vmatprep.mubr.msk.bf16.mxu0 %vm410_vm0, %v1400_v3  ;;  %1355 = vmatprep.mubr.msk.bf16.mxu1 %vm410_vm0, %v1416_v8  ;;  %v1419_v12 = vld [vmem:[%s2001_s0 + $0x98] sm:$0xff]   ;;  %v1420_v13 = vld [vmem:[%s2001_s0 + $0xa0] sm:$0xff]   ;;  %v1405_v14 = vld [vmem:[%s2001_s0 + $0x28] sm:$0xff]  }
   0x6   :  { %v1406_v15 = vld [vmem:[%s2001_s0 + $0x30] sm:$0xff]   ;;  %v1421_v16 = vld [vmem:[%s2001_s0 + $0xa8] sm:$0xff]   ;;  %v1407_v18 = vld [vmem:[%s2001_s0 + $0x38] sm:$0xff]  }
   0x7   :  { %1318 = vmatpush3.bf16.msra.mxu0 %v1397_v1  ;;  %1392 = vmatpush3.bf16.msra.mxu1 %v1397_v1  ;;  %v1422_v17 = vld [vmem:[%s2001_s0 + $0xb0] sm:$0xff]   ;;  %v1408_v19 = vld [vmem:[%s2001_s0 + $0x40] sm:$0xff]   ;;  %v1423_v20 = vld [vmem:[%s2001_s0 + $0xb8] sm:$0xff]  }
   0x8   :  { %1319 = vmatprep.subr.bf16.mxu0 %v1398_v2  ;;  %1389 = vmatprep.subr.bf16.mxu1 %v1398_v2  ;;  %v1424_v21 = vld [vmem:[%s2001_s0 + $0xc0] sm:$0xff]   ;;  %v1409_v22 = vld [vmem:[%s2001_s0 + $0x48] sm:$0xff]   ;;  %v1410_v23 = vld [vmem:[%s2001_s0 + $0x50] sm:$0xff]  }
   0x9   :  { %v1425_v24 = vld [vmem:[%s2001_s0 + $0xc8] sm:$0xff]   ;;  %v1426_v25 = vld [vmem:[%s2001_s0 + $0xd0] sm:$0xff]   ;;  %v1411_v26 = vld [vmem:[%s2001_s0 + $0x58] sm:$0xff]  }
   0xa   :  { %v1412_v27 = vld [vmem:[%s2001_s0 + $0x60] sm:$0xff]   ;;  %v1427_v28 = vld [vmem:[%s2001_s0 + $0xd8] sm:$0xff]   ;;  %v1413_v30 = vld [vmem:[%s2001_s0 + $0x68] sm:$0xff]  }
   0xb   :  { %1320 = vmatpush3.bf16.msra.mxu0 %v1398_v2  ;;  %1393 = vmatpush3.bf16.msra.mxu1 %v1398_v2  ;;  %v1428_v29 = vld [vmem:[%s2001_s0 + $0xe0] sm:$0xff]   ;;  %v1414_v31 = vld [vmem:[%s2001_s0 + $0x70] sm:$0xff]   ;;  %v1429_v32 = vld [vmem:[%s2001_s0 + $0xe8] sm:$0xff]  }
   0xc   :  { %1321 = vmatprep.subr.bf16.mxu0 %v1399_v4  ;;  %1390 = vmatprep.subr.bf16.mxu1 %v1399_v4  ;;  %v1430_v33 = vld [vmem:[%s2001_s0 + $0xf0] sm:$0xff]   ;;  %v1415_v34 = vld [vmem:[%s2001_s0 + $0x78] sm:$0xff]  }
   0xd   :  { %v1431_v35 = vld [vmem:[%s2001_s0 + $0xf8] sm:$0xff]  }
   0xf   :  { %1322 = vmatpush3.bf16.msra.mxu0 %v1399_v4  ;;  %1394 = vmatpush3.bf16.msra.mxu1 %v1399_v4 }
  0x12   :  { %1324 = vmatmul.mubr.msk.bf16.vlgmr.msra.gmra.mrb[0].mxu0 %vm410_vm0, %v1401_v5  ;;  %1356 = vmatmul.mubr.msk.bf16.vlgmr.msra.gmra.mrb[0].mxu1 %vm410_vm0, %v1417_v9 }
  0x13   :  { %1327 = vmatprep.mubr.msk.bf16.mxu0 %vm410_vm0, %v1402_v6  ;;  %1359 = vmatprep.mubr.msk.bf16.mxu1 %vm410_vm0, %v1418_v10 }
  0x1a   :  { %1328 = vmatmul.mubr.msk.bf16.gmra.mrb[4].mxu0 %vm410_vm0, %v1403_v7  ;;  %1360 = vmatmul.mubr.msk.bf16.gmra.mrb[4].mxu1 %vm410_vm0, %v1419_v12 }
  0x1b   :  { %1331 = vmatprep.mubr.msk.bf16.mxu0 %vm410_vm0, %v1404_v11  ;;  %1363 = vmatprep.mubr.msk.bf16.mxu1 %vm410_vm0, %v1420_v13 }
  0x22   :  { %1332 = vmatmul.mubr.msk.bf16.gmra.mrb[8].mxu0 %vm410_vm0, %v1405_v14  ;;  %1364 = vmatmul.mubr.msk.bf16.gmra.mrb[8].mxu1 %vm410_vm0, %v1421_v16 }
  0x23   :  { %1335 = vmatprep.mubr.msk.bf16.mxu0 %vm410_vm0, %v1406_v15  ;;  %1367 = vmatprep.mubr.msk.bf16.mxu1 %vm410_vm0, %v1422_v17 }
  0x2a   :  { %1336 = vmatmul.mubr.msk.bf16.gmra.mrb[12].mxu0 %vm410_vm0, %v1407_v18  ;;  %1368 = vmatmul.mubr.msk.bf16.gmra.mrb[12].mxu1 %vm410_vm0, %v1423_v20 }
  0x2b   :  { %1339 = vmatprep.mubr.msk.bf16.mxu0 %vm410_vm0, %v1408_v19  ;;  %1371 = vmatprep.mubr.msk.bf16.mxu1 %vm410_vm0, %v1424_v21 }
  0x32   :  { %1340 = vmatmul.mubr.msk.bf16.gmra.mrb[16].mxu0 %vm410_vm0, %v1409_v22  ;;  %1372 = vmatmul.mubr.msk.bf16.gmra.mrb[16].mxu1 %vm410_vm0, %v1425_v24 }
  0x33   :  { %1343 = vmatprep.mubr.msk.bf16.mxu0 %vm410_vm0, %v1410_v23  ;;  %1375 = vmatprep.mubr.msk.bf16.mxu1 %vm410_vm0, %v1426_v25 }
  0x3a   :  { %1344 = vmatmul.mubr.msk.bf16.gmra.mrb[20].mxu0 %vm410_vm0, %v1411_v26  ;;  %1376 = vmatmul.mubr.msk.bf16.gmra.mrb[20].mxu1 %vm410_vm0, %v1427_v28 }
  0x3b   :  { %1347 = vmatprep.mubr.msk.bf16.mxu0 %vm410_vm0, %v1412_v27  ;;  %1379 = vmatprep.mubr.msk.bf16.mxu1 %vm410_vm0, %v1428_v29 }
  0x42   :  { %1348 = vmatmul.mubr.msk.bf16.gmra.mrb[24].mxu0 %vm410_vm0, %v1413_v30  ;;  %1380 = vmatmul.mubr.msk.bf16.gmra.mrb[24].mxu1 %vm410_vm0, %v1429_v32 }
  0x43   :  { %1351 = vmatprep.mubr.msk.bf16.mxu0 %vm410_vm0, %v1414_v31  ;;  %1383 = vmatprep.mubr.msk.bf16.mxu1 %vm410_vm0, %v1430_v33 }
  0x4a   :  { %1352 = vmatmul.mubr.msk.bf16.gmra.mrb[28].mxu0 %vm410_vm0, %v1415_v34  ;;  %1384 = vmatmul.mubr.msk.bf16.gmra.mrb[28].mxu1 %vm410_vm0, %v1431_v35 }
  0xe5   :  { %v1325_v37 = vpop.f32.mrb[0].mxu0  ;;  %v1613_v41 = vpop.f32.mrb[0].mxu1 }
  0xe6   :  { %v541_v38 = vpop.f32.mrb[1].mxu0  ;;  %862 = vst [vmem:[%s2004_s2 + $0x10] sm:$0xff] %v1325_v37  ;;  %v1618_v45 = vpop.f32.mrb[1].mxu1  ;;  %v1066_v47 = vmul.f32 %v1325_v37, %v1325_v37  ;;  %894 = vst [vmem:[%s2004_s2 + $0x110] sm:$0xff] %v1613_v41 }
  0xe7   :  { %v1326_v39 = vpop.f32.mrb[2].mxu0  ;;  %860 = vst [vmem:[%s2004_s2] sm:$0xff] %v541_v38  ;;  %v1064_v42 = vmul.f32 %v541_v38, %v541_v38  ;;  %v1620_v46 = vpop.f32.mrb[2].mxu1  ;;  %892 = vst [vmem:[%s2004_s2 + $0x100] sm:$0xff] %v1618_v45 }
  0xe8   :  { %v544_v40 = vpop.f32.mrb[3].mxu0  ;;  %863 = vst [vmem:[%s2004_s2 + $0x18] sm:$0xff] %v1326_v39  ;;  %v1626_v51 = vpop.f32.mrb[3].mxu1  ;;  %v1067_v53 = vmul.f32 %v1326_v39, %v1326_v39  ;;  %895 = vst [vmem:[%s2004_s2 + $0x118] sm:$0xff] %v1620_v46 }
  0xe9   :  { %861 = vst [vmem:[%s2004_s2 + $0x8] sm:$0xff] %v544_v40  ;;  %v992_v43 = vadd.f32 %v544_v40, %v541_v38  ;;  %v1065_v44 = vmul.f32 %v544_v40, %v544_v40  ;;  %893 = vst [vmem:[%s2004_s2 + $0x108] sm:$0xff] %v1626_v51 }
  0xeb   :  { %v993_v48 = vadd.f32 %v1325_v37, %v992_v43  ;;  %v1128_v49 = vadd.f32 %v1065_v44, %v1064_v42 }
  0xed   :  { %v1329_v50 = vpop.f32.mrb[4].mxu0  ;;  %v994_v54 = vadd.f32 %v1326_v39, %v993_v48  ;;  %v1129_v55 = vadd.f32 %v1128_v49, %v1066_v47  ;;  %v1649_v61 = vpop.f32.mrb[4].mxu1 }
  0xee   :  { %v557_v52 = vpop.f32.mrb[5].mxu0  ;;  %866 = vst [vmem:[%s2004_s2 + $0x30] sm:$0xff] %v1329_v50  ;;  %v1654_v1 = vpop.f32.mrb[5].mxu1  ;;  %v1070_v3 = vmul.f32 %v1329_v50, %v1329_v50  ;;  %898 = vst [vmem:[%s2004_s2 + $0x130] sm:$0xff] %v1649_v61 }
  0xef   :  { %v1330_v56 = vpop.f32.mrb[6].mxu0  ;;  %v1130_v58 = vadd.f32 %v1129_v55, %v1067_v53  ;;  %864 = vst [vmem:[%s2004_s2 + $0x20] sm:$0xff] %v557_v52  ;;  %v995_v59 = vadd.f32 %v994_v54, %v557_v52  ;;  %v1068_v60 = vmul.f32 %v557_v52, %v557_v52  ;;  %v1656_v2 = vpop.f32.mrb[6].mxu1  ;;  %896 = vst [vmem:[%s2004_s2 + $0x120] sm:$0xff] %v1654_v1 }
  0xf0   :  { %v560_v57 = vpop.f32.mrb[7].mxu0  ;;  %867 = vst [vmem:[%s2004_s2 + $0x38] sm:$0xff] %v1330_v56  ;;  %v1662_v7 = vpop.f32.mrb[7].mxu1  ;;  %v1071_v9 = vmul.f32 %v1330_v56, %v1330_v56  ;;  %899 = vst [vmem:[%s2004_s2 + $0x138] sm:$0xff] %v1656_v2 }
  0xf1   :  { %v1131_v62 = vadd.f32 %v1130_v58, %v1068_v60  ;;  %865 = vst [vmem:[%s2004_s2 + $0x28] sm:$0xff] %v560_v57  ;;  %v996_v63 = vadd.f32 %v995_v59, %v560_v57  ;;  %v1069_v0 = vmul.f32 %v560_v57, %v560_v57  ;;  %897 = vst [vmem:[%s2004_s2 + $0x128] sm:$0xff] %v1662_v7 }
  0xf3   :  { %v997_v4 = vadd.f32 %v1329_v50, %v996_v63  ;;  %v1132_v5 = vadd.f32 %v1131_v62, %v1069_v0 }
  0xf5   :  { %v1333_v6 = vpop.f32.mrb[8].mxu0  ;;  %v1133_v10 = vadd.f32 %v1132_v5, %v1070_v3  ;;  %v998_v11 = vadd.f32 %v1330_v56, %v997_v4  ;;  %v1685_v17 = vpop.f32.mrb[8].mxu1 }
  0xf6   :  { %v573_v8 = vpop.f32.mrb[9].mxu0  ;;  %870 = vst [vmem:[%s2004_s2 + $0x50] sm:$0xff] %v1333_v6  ;;  %v1690_v21 = vpop.f32.mrb[9].mxu1  ;;  %v1074_v23 = vmul.f32 %v1333_v6, %v1333_v6  ;;  %902 = vst [vmem:[%s2004_s2 + $0x150] sm:$0xff] %v1685_v17 }
  0xf7   :  { %v1334_v12 = vpop.f32.mrb[10].mxu0  ;;  %868 = vst [vmem:[%s2004_s2 + $0x40] sm:$0xff] %v573_v8  ;;  %v999_v14 = vadd.f32 %v998_v11, %v573_v8  ;;  %v1072_v15 = vmul.f32 %v573_v8, %v573_v8  ;;  %v1134_v16 = vadd.f32 %v1133_v10, %v1071_v9  ;;  %v1692_v22 = vpop.f32.mrb[10].mxu1  ;;  %900 = vst [vmem:[%s2004_s2 + $0x140] sm:$0xff] %v1690_v21 }
  0xf8   :  { %v576_v13 = vpop.f32.mrb[11].mxu0  ;;  %871 = vst [vmem:[%s2004_s2 + $0x58] sm:$0xff] %v1334_v12  ;;  %v1698_v27 = vpop.f32.mrb[11].mxu1  ;;  %v1075_v29 = vmul.f32 %v1334_v12, %v1334_v12  ;;  %903 = vst [vmem:[%s2004_s2 + $0x158] sm:$0xff] %v1692_v22 }
  0xf9   :  { %v1135_v18 = vadd.f32 %v1134_v16, %v1072_v15  ;;  %869 = vst [vmem:[%s2004_s2 + $0x48] sm:$0xff] %v576_v13  ;;  %v1000_v19 = vadd.f32 %v999_v14, %v576_v13  ;;  %v1073_v20 = vmul.f32 %v576_v13, %v576_v13  ;;  %901 = vst [vmem:[%s2004_s2 + $0x148] sm:$0xff] %v1698_v27 }
  0xfb   :  { %v1001_v24 = vadd.f32 %v1333_v6, %v1000_v19  ;;  %v1136_v25 = vadd.f32 %v1135_v18, %v1073_v20 }
  0xfd   :  { %v1337_v26 = vpop.f32.mrb[12].mxu0  ;;  %v1137_v30 = vadd.f32 %v1136_v25, %v1074_v23  ;;  %v1002_v31 = vadd.f32 %v1334_v12, %v1001_v24  ;;  %v1721_v37 = vpop.f32.mrb[12].mxu1 }
  0xfe   :  { %v589_v28 = vpop.f32.mrb[13].mxu0  ;;  %874 = vst [vmem:[%s2004_s2 + $0x70] sm:$0xff] %v1337_v26  ;;  %v1726_v42 = vpop.f32.mrb[13].mxu1  ;;  %v1078_v44 = vmul.f32 %v1337_v26, %v1337_v26  ;;  %906 = vst [vmem:[%s2004_s2 + $0x170] sm:$0xff] %v1721_v37 }
  0xff   :  { %v1338_v32 = vpop.f32.mrb[14].mxu0  ;;  %872 = vst [vmem:[%s2004_s2 + $0x60] sm:$0xff] %v589_v28  ;;  %v1003_v34 = vadd.f32 %v1002_v31, %v589_v28  ;;  %v1076_v35 = vmul.f32 %v589_v28, %v589_v28  ;;  %v1138_v36 = vadd.f32 %v1137_v30, %v1075_v29  ;;  %v1728_v43 = vpop.f32.mrb[14].mxu1  ;;  %904 = vst [vmem:[%s2004_s2 + $0x160] sm:$0xff] %v1726_v42 }
 0x100   :  { %v592_v33 = vpop.f32.mrb[15].mxu0  ;;  %875 = vst [vmem:[%s2004_s2 + $0x78] sm:$0xff] %v1338_v32  ;;  %v1734_v50 = vpop.f32.mrb[15].mxu1  ;;  %v1079_v53 = vmul.f32 %v1338_v32, %v1338_v32  ;;  %907 = vst [vmem:[%s2004_s2 + $0x178] sm:$0xff] %v1728_v43 }
 0x101   :  { %v1139_v38 = vadd.f32 %v1138_v36, %v1076_v35  ;;  %873 = vst [vmem:[%s2004_s2 + $0x68] sm:$0xff] %v592_v33  ;;  %v1004_v39 = vadd.f32 %v1003_v34, %v592_v33  ;;  %v1077_v40 = vmul.f32 %v592_v33, %v592_v33  ;;  %905 = vst [vmem:[%s2004_s2 + $0x168] sm:$0xff] %v1734_v50 }
 0x103   :  { %v1005_v47 = vadd.f32 %v1337_v26, %v1004_v39  ;;  %v1140_v48 = vadd.f32 %v1139_v38, %v1077_v40 }
 0x105   :  { %v1341_v49 = vpop.f32.mrb[16].mxu0  ;;  %v1141_v54 = vadd.f32 %v1140_v48, %v1078_v44  ;;  %v1006_v55 = vadd.f32 %v1338_v32, %v1005_v47  ;;  %v1757_v62 = vpop.f32.mrb[16].mxu1 }
 0x106   :  { %v605_v52 = vpop.f32.mrb[17].mxu0  ;;  %878 = vst [vmem:[%s2004_s2 + $0x90] sm:$0xff] %v1341_v49  ;;  %v1762_v4 = vpop.f32.mrb[17].mxu1  ;;  %v1082_v6 = vmul.f32 %v1341_v49, %v1341_v49  ;;  %910 = vst [vmem:[%s2004_s2 + $0x190] sm:$0xff] %v1757_v62 }
 0x107   :  { %v1342_v56 = vpop.f32.mrb[18].mxu0  ;;  %876 = vst [vmem:[%s2004_s2 + $0x80] sm:$0xff] %v605_v52  ;;  %v1007_v58 = vadd.f32 %v1006_v55, %v605_v52  ;;  %v1080_v59 = vmul.f32 %v605_v52, %v605_v52  ;;  %v1142_v60 = vadd.f32 %v1141_v54, %v1079_v53  ;;  %v1764_v5 = vpop.f32.mrb[18].mxu1  ;;  %908 = vst [vmem:[%s2004_s2 + $0x180] sm:$0xff] %v1762_v4 }
 0x108   :  { %v608_v57 = vpop.f32.mrb[19].mxu0  ;;  %879 = vst [vmem:[%s2004_s2 + $0x98] sm:$0xff] %v1342_v56  ;;  %v1770_v11 = vpop.f32.mrb[19].mxu1  ;;  %v1083_v13 = vmul.f32 %v1342_v56, %v1342_v56  ;;  %911 = vst [vmem:[%s2004_s2 + $0x198] sm:$0xff] %v1764_v5 }
 0x109   :  { %v1143_v63 = vadd.f32 %v1142_v60, %v1080_v59  ;;  %877 = vst [vmem:[%s2004_s2 + $0x88] sm:$0xff] %v608_v57  ;;  %v1008_v0 = vadd.f32 %v1007_v58, %v608_v57  ;;  %v1081_v3 = vmul.f32 %v608_v57, %v608_v57  ;;  %909 = vst [vmem:[%s2004_s2 + $0x188] sm:$0xff] %v1770_v11 }
 0x10b   :  { %v1009_v8 = vadd.f32 %v1341_v49, %v1008_v0  ;;  %v1144_v9 = vadd.f32 %v1143_v63, %v1081_v3 }
 0x10d   :  { %v1345_v10 = vpop.f32.mrb[20].mxu0  ;;  %v1145_v14 = vadd.f32 %v1144_v9, %v1082_v6  ;;  %v1010_v15 = vadd.f32 %v1342_v56, %v1009_v8  ;;  %v1793_v24 = vpop.f32.mrb[20].mxu1 }
 0x10e   :  { %v621_v12 = vpop.f32.mrb[21].mxu0  ;;  %882 = vst [vmem:[%s2004_s2 + $0xb0] sm:$0xff] %v1345_v10  ;;  %v1798_v29 = vpop.f32.mrb[21].mxu1  ;;  %v1086_v31 = vmul.f32 %v1345_v10, %v1345_v10  ;;  %914 = vst [vmem:[%s2004_s2 + $0x1b0] sm:$0xff] %v1793_v24 }
 0x10f   :  { %v1346_v16 = vpop.f32.mrb[22].mxu0  ;;  %880 = vst [vmem:[%s2004_s2 + $0xa0] sm:$0xff] %v621_v12  ;;  %v1011_v19 = vadd.f32 %v1010_v15, %v621_v12  ;;  %v1084_v20 = vmul.f32 %v621_v12, %v621_v12  ;;  %v1146_v23 = vadd.f32 %v1145_v14, %v1083_v13  ;;  %v1800_v30 = vpop.f32.mrb[22].mxu1  ;;  %912 = vst [vmem:[%s2004_s2 + $0x1a0] sm:$0xff] %v1798_v29 }
 0x110   :  { %v624_v18 = vpop.f32.mrb[23].mxu0  ;;  %883 = vst [vmem:[%s2004_s2 + $0xb8] sm:$0xff] %v1346_v16  ;;  %v1806_v35 = vpop.f32.mrb[23].mxu1  ;;  %v1087_v38 = vmul.f32 %v1346_v16, %v1346_v16  ;;  %915 = vst [vmem:[%s2004_s2 + $0x1b8] sm:$0xff] %v1800_v30 }
 0x111   :  { %v1147_v25 = vadd.f32 %v1146_v23, %v1084_v20  ;;  %881 = vst [vmem:[%s2004_s2 + $0xa8] sm:$0xff] %v624_v18  ;;  %v1012_v26 = vadd.f32 %v1011_v19, %v624_v18  ;;  %v1085_v28 = vmul.f32 %v624_v18, %v624_v18  ;;  %913 = vst [vmem:[%s2004_s2 + $0x1a8] sm:$0xff] %v1806_v35 }
 0x113   :  { %v1013_v32 = vadd.f32 %v1345_v10, %v1012_v26  ;;  %v1148_v33 = vadd.f32 %v1147_v25, %v1085_v28 }
 0x115   :  { %v1349_v34 = vpop.f32.mrb[24].mxu0  ;;  %v1149_v39 = vadd.f32 %v1148_v33, %v1086_v31  ;;  %v1014_v40 = vadd.f32 %v1346_v16, %v1013_v32  ;;  %v1829_v53 = vpop.f32.mrb[24].mxu1 }
 0x116   :  { %v637_v36 = vpop.f32.mrb[25].mxu0  ;;  %886 = vst [vmem:[%s2004_s2 + $0xd0] sm:$0xff] %v1349_v34  ;;  %v1834_v57 = vpop.f32.mrb[25].mxu1  ;;  %v1090_v59 = vmul.f32 %v1349_v34, %v1349_v34  ;;  %918 = vst [vmem:[%s2004_s2 + $0x1d0] sm:$0xff] %v1829_v53 }
 0x117   :  { %v1350_v44 = vpop.f32.mrb[26].mxu0  ;;  %884 = vst [vmem:[%s2004_s2 + $0xc0] sm:$0xff] %v637_v36  ;;  %v1015_v48 = vadd.f32 %v1014_v40, %v637_v36  ;;  %v1088_v49 = vmul.f32 %v637_v36, %v637_v36  ;;  %v1150_v52 = vadd.f32 %v1149_v39, %v1087_v38  ;;  %v1836_v58 = vpop.f32.mrb[26].mxu1  ;;  %916 = vst [vmem:[%s2004_s2 + $0x1c0] sm:$0xff] %v1834_v57 }
 0x118   :  { %v640_v47 = vpop.f32.mrb[27].mxu0  ;;  %887 = vst [vmem:[%s2004_s2 + $0xd8] sm:$0xff] %v1350_v44  ;;  %v1842_v3 = vpop.f32.mrb[27].mxu1  ;;  %v1091_v8 = vmul.f32 %v1350_v44, %v1350_v44  ;;  %919 = vst [vmem:[%s2004_s2 + $0x1d8] sm:$0xff] %v1836_v58  ;;  %v1096_v39 = vmul.f32 %v1618_v45, %v1618_v45 }
 0x119   :  { %v1151_v54 = vadd.f32 %v1150_v52, %v1088_v49  ;;  %885 = vst [vmem:[%s2004_s2 + $0xc8] sm:$0xff] %v640_v47  ;;  %v1016_v55 = vadd.f32 %v1015_v48, %v640_v47  ;;  %v1089_v56 = vmul.f32 %v640_v47, %v640_v47  ;;  %917 = vst [vmem:[%s2004_s2 + $0x1c8] sm:$0xff] %v1842_v3 }
 0x11a   :  { %v1097_v49 = vmul.f32 %v1626_v51, %v1626_v51  ;;  %v1098_v52 = vmul.f32 %v1613_v41, %v1613_v41 }
 0x11b   :  { %v1017_v60 = vadd.f32 %v1349_v34, %v1016_v55  ;;  %v1152_v63 = vadd.f32 %v1151_v54, %v1089_v56  ;;  %v1099_v56 = vmul.f32 %v1620_v46, %v1620_v46 }
 0x11d   :  { %v1353_v0 = vpop.f32.mrb[28].mxu0  ;;  %v1153_v9 = vadd.f32 %v1152_v63, %v1090_v59  ;;  %v1018_v10 = vadd.f32 %v1350_v44, %v1017_v60  ;;  %v1865_v18 = vpop.f32.mrb[28].mxu1 }
 0x11e   :  { %v653_v6 = vpop.f32.mrb[29].mxu0  ;;  %890 = vst [vmem:[%s2004_s2 + $0xf0] sm:$0xff] %v1353_v0  ;;  %v1870_v25 = vpop.f32.mrb[29].mxu1  ;;  %v1094_v28 = vmul.f32 %v1353_v0, %v1353_v0  ;;  %922 = vst [vmem:[%s2004_s2 + $0x1f0] sm:$0xff] %v1865_v18 }
 0x11f   :  { %v1354_v12 = vpop.f32.mrb[30].mxu0  ;;  %888 = vst [vmem:[%s2004_s2 + $0xe0] sm:$0xff] %v653_v6  ;;  %v1019_v14 = vadd.f32 %v1018_v10, %v653_v6  ;;  %v1092_v15 = vmul.f32 %v653_v6, %v653_v6  ;;  %v1154_v16 = vadd.f32 %v1153_v9, %v1091_v8  ;;  %v1872_v26 = vpop.f32.mrb[30].mxu1  ;;  %920 = vst [vmem:[%s2004_s2 + $0x1e0] sm:$0xff] %v1870_v25 }
 0x120   :  { %v656_v13 = vpop.f32.mrb[31].mxu0  ;;  %891 = vst [vmem:[%s2004_s2 + $0xf8] sm:$0xff] %v1354_v12  ;;  %v1878_v33 = vpop.f32.mrb[31].mxu1  ;;  %v1095_v34 = vmul.f32 %v1354_v12, %v1354_v12  ;;  %923 = vst [vmem:[%s2004_s2 + $0x1f8] sm:$0xff] %v1872_v26  ;;  %v1101_v8 = vmul.f32 %v1662_v7, %v1662_v7 }
 0x121   :  { %v1155_v19 = vadd.f32 %v1154_v16, %v1092_v15  ;;  %889 = vst [vmem:[%s2004_s2 + $0xe8] sm:$0xff] %v656_v13  ;;  %v1020_v20 = vadd.f32 %v1019_v14, %v656_v13  ;;  %v1093_v23 = vmul.f32 %v656_v13, %v656_v13  ;;  %921 = vst [vmem:[%s2004_s2 + $0x1e8] sm:$0xff] %v1878_v33 }
 0x123   :  { %v1021_v31 = vadd.f32 %v1353_v0, %v1020_v20  ;;  %v1156_v32 = vadd.f32 %v1155_v19, %v1093_v23  ;;  %v1105_v19 = vmul.f32 %v1698_v27, %v1698_v27 }
 0x125   :  { %v1157_v36 = vadd.f32 %v1156_v32, %v1094_v28  ;;  %v1022_v38 = vadd.f32 %v1354_v12, %v1021_v31 }
 0x127   :  { %v1023_v40 = vadd.f32 %v1022_v38, %v1618_v45  ;;  %v1158_v44 = vadd.f32 %v1157_v36, %v1095_v34  ;;  %v1100_v45 = vmul.f32 %v1654_v1, %v1654_v1  ;;  %v1109_v38 = vmul.f32 %v1734_v50, %v1734_v50 }
 0x129   :  { %v1159_v47 = vadd.f32 %v1158_v44, %v1096_v39  ;;  %v1024_v48 = vadd.f32 %v1023_v40, %v1626_v51 }
 0x12b   :  { %v1025_v54 = vadd.f32 %v1613_v41, %v1024_v48  ;;  %v1160_v55 = vadd.f32 %v1159_v47, %v1097_v49  ;;  %v1102_v41 = vmul.f32 %v1649_v61, %v1649_v61 }
 0x12d   :  { %v1161_v59 = vadd.f32 %v1160_v55, %v1098_v52  ;;  %v1026_v60 = vadd.f32 %v1620_v46, %v1025_v54  ;;  %v1103_v46 = vmul.f32 %v1656_v2, %v1656_v2  ;;  %v1113_v54 = vmul.f32 %v1770_v11, %v1770_v11 }
 0x12f   :  { %v1027_v63 = vadd.f32 %v1026_v60, %v1654_v1  ;;  %v1162_v0 = vadd.f32 %v1161_v59, %v1099_v56  ;;  %v1104_v1 = vmul.f32 %v1690_v21, %v1690_v21 }
 0x131   :  { %v1163_v6 = vadd.f32 %v1162_v0, %v1100_v45  ;;  %v1028_v51 = vadd.f32 %v1027_v63, %v1662_v7 }
 0x133   :  { %v1029_v9 = vadd.f32 %v1649_v61, %v1028_v51  ;;  %v1164_v10 = vadd.f32 %v1163_v6, %v1101_v8  ;;  %v1106_v61 = vmul.f32 %v1685_v17, %v1685_v17  ;;  %v1117_v6 = vmul.f32 %v1806_v35, %v1806_v35 }
 0x135   :  { %v1165_v12 = vadd.f32 %v1164_v10, %v1102_v41  ;;  %v1030_v13 = vadd.f32 %v1656_v2, %v1029_v9  ;;  %v1107_v2 = vmul.f32 %v1692_v22, %v1692_v22 }
 0x137   :  { %v1031_v14 = vadd.f32 %v1030_v13, %v1690_v21  ;;  %v1166_v15 = vadd.f32 %v1165_v12, %v1103_v46  ;;  %v1108_v21 = vmul.f32 %v1726_v42, %v1726_v42  ;;  %v1121_v13 = vmul.f32 %v1842_v3, %v1842_v3 }
 0x139   :  { %v1167_v16 = vadd.f32 %v1166_v15, %v1104_v1  ;;  %v1032_v7 = vadd.f32 %v1031_v14, %v1698_v27 }
 0x13b   :  { %v1033_v20 = vadd.f32 %v1685_v17, %v1032_v7  ;;  %v1168_v23 = vadd.f32 %v1167_v16, %v1105_v19  ;;  %v1110_v17 = vmul.f32 %v1721_v37, %v1721_v37 }
 0x13d   :  { %v1169_v28 = vadd.f32 %v1168_v23, %v1106_v61  ;;  %v1034_v31 = vadd.f32 %v1692_v22, %v1033_v20  ;;  %v1111_v22 = vmul.f32 %v1728_v43, %v1728_v43  ;;  %v1125_v20 = vmul.f32 %v1878_v33, %v1878_v33 }
 0x13f   :  { %v1035_v32 = vadd.f32 %v1034_v31, %v1726_v42  ;;  %v1170_v34 = vadd.f32 %v1169_v28, %v1107_v2  ;;  %v1112_v42 = vmul.f32 %v1762_v4, %v1762_v4 }
 0x141   :  { %v1171_v36 = vadd.f32 %v1170_v34, %v1108_v21  ;;  %v1036_v27 = vadd.f32 %v1035_v32, %v1734_v50 }
 0x143   :  { %v1037_v39 = vadd.f32 %v1721_v37, %v1036_v27  ;;  %v1172_v40 = vadd.f32 %v1171_v36, %v1109_v38  ;;  %v1114_v37 = vmul.f32 %v1757_v62, %v1757_v62 }
 0x145   :  { %v1173_v44 = vadd.f32 %v1172_v40, %v1110_v17  ;;  %v1038_v47 = vadd.f32 %v1728_v43, %v1037_v39  ;;  %v1115_v43 = vmul.f32 %v1764_v5, %v1764_v5 }
 0x147   :  { %v1039_v48 = vadd.f32 %v1038_v47, %v1762_v4  ;;  %v1174_v49 = vadd.f32 %v1173_v44, %v1111_v22  ;;  %v1116_v4 = vmul.f32 %v1798_v29, %v1798_v29 }
 0x149   :  { %v1175_v52 = vadd.f32 %v1174_v49, %v1112_v42  ;;  %v1040_v50 = vadd.f32 %v1039_v48, %v1770_v11 }
 0x14b   :  { %v1041_v55 = vadd.f32 %v1757_v62, %v1040_v50  ;;  %v1176_v56 = vadd.f32 %v1175_v52, %v1113_v54  ;;  %v1118_v62 = vmul.f32 %v1793_v24, %v1793_v24 }
 0x14d   :  { %v1177_v59 = vadd.f32 %v1176_v56, %v1114_v37  ;;  %v1042_v60 = vadd.f32 %v1764_v5, %v1041_v55  ;;  %v1119_v5 = vmul.f32 %v1800_v30, %v1800_v30 }
 0x14f   :  { %v1043_v45 = vadd.f32 %v1042_v60, %v1798_v29  ;;  %v1178_v63 = vadd.f32 %v1177_v59, %v1115_v43  ;;  %v1120_v29 = vmul.f32 %v1834_v57, %v1834_v57 }
 0x151   :  { %v1179_v0 = vadd.f32 %v1178_v63, %v1116_v4  ;;  %v1044_v11 = vadd.f32 %v1043_v45, %v1806_v35 }
 0x153   :  { %v1045_v51 = vadd.f32 %v1793_v24, %v1044_v11  ;;  %v1180_v8 = vadd.f32 %v1179_v0, %v1117_v6  ;;  %v1122_v24 = vmul.f32 %v1829_v53, %v1829_v53 }
 0x155   :  { %v1181_v41 = vadd.f32 %v1180_v8, %v1118_v62  ;;  %v1046_v9 = vadd.f32 %v1800_v30, %v1045_v51  ;;  %v1123_v30 = vmul.f32 %v1836_v58, %v1836_v58 }
 0x157   :  { %v1047_v10 = vadd.f32 %v1046_v9, %v1834_v57  ;;  %v1182_v46 = vadd.f32 %v1181_v41, %v1119_v5  ;;  %v1124_v57 = vmul.f32 %v1870_v25, %v1870_v25 }
 0x159   :  { %v1183_v12 = vadd.f32 %v1182_v46, %v1120_v29  ;;  %v1048_v35 = vadd.f32 %v1047_v10, %v1842_v3 }
 0x15b   :  { %v1049_v1 = vadd.f32 %v1829_v53, %v1048_v35  ;;  %v1184_v14 = vadd.f32 %v1183_v12, %v1121_v13  ;;  %v1126_v53 = vmul.f32 %v1865_v18, %v1865_v18 }
 0x15d   :  { %v1185_v15 = vadd.f32 %v1184_v14, %v1122_v24  ;;  %v1050_v16 = vadd.f32 %v1836_v58, %v1049_v1  ;;  %v1127_v58 = vmul.f32 %v1872_v26, %v1872_v26 }
 0x15f   :  { %v1051_v7 = vadd.f32 %v1050_v16, %v1870_v25  ;;  %v1186_v19 = vadd.f32 %v1185_v15, %v1123_v30 }
 0x161   :  { %v1187_v61 = vadd.f32 %v1186_v19, %v1124_v57  ;;  %v1052_v3 = vadd.f32 %v1051_v7, %v1878_v33 }
 0x163   :  { %v1053_v23 = vadd.f32 %v1865_v18, %v1052_v3  ;;  %v1188_v2 = vadd.f32 %v1187_v61, %v1125_v20  ;;  %v991_v18 = vld [vmem:[%s2002_s3] sm:$0x1] }
 0x165   :  { %v1054_v28 = vadd.f32 %v1872_v26, %v1053_v23  ;;  %v1189_v31 = vadd.f32 %v1188_v2, %v1126_v53  ;;  %v1063_v26 = vld [vmem:[%s2003_s4] sm:$0x1] }
 0x167   :  { %v1055_v25 = vrot.slane %v1054_v28, 4  ;;  %v1190_v21 = vadd.f32 %v1189_v31, %v1127_v58 }
 0x169   :  { %v1056_v32 = vadd.f32 %v1055_v25, %v1054_v28  ;;  %v1191_v34 = vrot.slane %v1190_v21, 4 }
 0x16b   :  { %v1057_v36 = vrot.slane %v1056_v32, 2  ;;  %v1192_v27 = vadd.f32 %v1191_v34, %v1190_v21 }
 0x16d   :  { %v1058_v38 = vadd.f32 %v1057_v36, %v1056_v32  ;;  %v1193_v33 = vrot.slane %v1192_v27, 2 }
 0x16f   :  { %v1059_v17 = vrot.slane %v1058_v38, 1  ;;  %v1194_v39 = vadd.f32 %v1193_v33, %v1192_v27 }
 0x171   :  { %v1060_v40 = vadd.f32 %v1059_v17, %v1058_v38  ;;  %v1195_v22 = vrot.slane %v1194_v39, 1 }
 0x173   :  { %v1061_v44 = vadd.f32 %v1060_v40, %v991_v18  ;;  %v1196_v47 = vadd.f32 %v1195_v22, %v1194_v39 }
 0x175   :  { %1062 = vst [vmem:[%s2002_s3] sm:$0x1] %v1061_v44  ;;  %v1197_v42 = vadd.f32 %v1196_v47, %v1063_v26 }
 0x177   :  { %1198 = vst [vmem:[%s2003_s4] sm:$0x1] %v1197_v42 }

</bundles_post_ra>
